<compile_context>
chip_gen: v5e
topology: v5e:2x2
jax: 0.10.0
libtpu: 0.0.40
codegen_flags: <defaults>
</compile_context>

<pallas_src>
import jax
import jax.numpy as jnp
from jax.experimental import pallas as pl
from jax.experimental.pallas import tpu as pltpu

LANE = 128                           # hardware lane width
SUBLANE = 8                          # f32 sublane granularity
TARGET_TILE_BYTES = 2 * 1024 * 1024  # per-buffer tile target (~85% HBM roofline regime)
SMALL_LIMIT_BYTES = 1 * 1024 * 1024  # single-block (no-grid) cutoff
MIN_GRID_STEPS = 4                   # keep both v7x TCs busy on the gridded path


def _scale_add_kernel(x_ref, o_ref):
    # x * 2 + 1 in one pass; dtype-matched constants (2 VALU ops per vreg,
    # no weak-type promotion churn, no per-batch loop — the PyTorch "+1"
    # loop over dim 0 is just a broadcast add).
    x = x_ref[...]
    two = jnp.asarray(2, dtype=x.dtype)
    one = jnp.asarray(1, dtype=x.dtype)
    o_ref[...] = x * two + one


def _round_up(n, m):
    return ((n + m - 1) // m) * m


def pt_module_forward(x):
    """Pallas equivalent of PtModule.forward: x * 2 + 1 (elementwise, any shape)."""
    orig_shape = x.shape
    total = x.size
    itemsize = x.dtype.itemsize

    # ---- lane-dense view: flatten, pad to a multiple of 128 lanes ----
    flat = x.reshape(-1)
    padded_total = _round_up(total, LANE)
    pad = padded_total - total
    if pad:
        flat = jnp.pad(flat, (0, pad))
    x2d = flat.reshape(padded_total // LANE, LANE)
    n_rows, n_cols = x2d.shape

    total_bytes = padded_total * itemsize
    cost = pl.CostEstimate(
        flops=2 * total,
        transcendentals=0,
        bytes_accessed=2 * total_bytes,  # read x + write out
    )

    if total_bytes <= SMALL_LIMIT_BYTES:
        # Tiny/medium case: whole array as one VMEM block, no grid at all.
        out2d = pl.pallas_call(
            _scale_add_kernel,
            out_shape=jax.ShapeDtypeStruct(x2d.shape, x2d.dtype),
            in_specs=[pl.BlockSpec(memory_space=pltpu.MemorySpace.VMEM)],
            out_specs=pl.BlockSpec(memory_space=pltpu.MemorySpace.VMEM),
            cost_estimate=cost,
        )(x2d)
    else:
        # Large case: dtype-aware row tile of ~TARGET_TILE_BYTES per buffer,
        # lane axis stays exactly 128 (unmasked stores).
        target_rows = max(SUBLANE, TARGET_TILE_BYTES // (LANE * itemsize))
        # Cap so the grid has at least MIN_GRID_STEPS steps (v7x dual-TC sharding).
        cap_rows = max(SUBLANE, _round_up(pl.cdiv(n_rows, MIN_GRID_STEPS), SUBLANE))
        row_tile = _round_up(int(min(target_rows, cap_rows)), SUBLANE)
        grid = (pl.cdiv(n_rows, row_tile),)
        out2d = pl.pallas_call(
            _scale_add_kernel,
            out_shape=jax.ShapeDtypeStruct(x2d.shape, x2d.dtype),
            grid=grid,
            in_specs=[pl.BlockSpec((row_tile, n_cols), lambda i: (i, 0))],
            out_specs=pl.BlockSpec((row_tile, n_cols), lambda i: (i, 0)),
            compiler_params=pltpu.CompilerParams(
                dimension_semantics=("parallel",),
            ),
            cost_estimate=cost,
        )(x2d)

    out_flat = out2d.reshape(-1)
    if pad:
        out_flat = out_flat[:total]
    return out_flat.reshape(orig_shape)


if __name__ == "__main__":
    key = jax.random.PRNGKey(0)

    # Primary case consistent with the module (NCHW): batch=2, channels=4, 16x16.
    x = jax.random.normal(key, (2, 4, 16, 16), dtype=jnp.float32)
    out = pt_module_forward(x)
    jax.block_until_ready(out)
    ref = x * 2 + 1
    assert out.shape == x.shape and out.dtype == x.dtype
    assert jnp.allclose(out, ref, atol=1e-6), "mismatch vs reference (small path)"

    # Non-multiple-of-128 element count: exercises the pad + lane-dense path.
    k1, k2 = jax.random.split(key)
    x_odd = jax.random.normal(k1, (2, 3, 5, 7), dtype=jnp.float32)
    out_odd = pt_module_forward(x_odd)
    jax.block_until_ready(out_odd)
    assert out_odd.shape == x_odd.shape
    assert jnp.allclose(out_odd, x_odd * 2 + 1, atol=1e-6), "mismatch vs reference (pad path)"

    # Moderately sized input: exercises the gridded (pipelined) path.
    x_big = jax.random.normal(k2, (4, 8, 128, 128), dtype=jnp.float32)  # 2 MiB
    out_big = pt_module_forward(x_big)
    jax.block_until_ready(out_big)
    assert jnp.allclose(out_big, x_big * 2 + 1, atol=1e-6), "mismatch vs reference (grid path)"

    print("KERNEL_OK")
</pallas_src>

<mosaic_0001>
module attributes {stable_mosaic.version = 11 : i64} {
  func.func @_scale_add_kernel(%arg0: memref<16x128xf32, #tpu.memory_space<vmem>>, %arg1: memref<16x128xf32, #tpu.memory_space<vmem>>) attributes {dimension_semantics = [], scalar_prefetch = 0 : i64, scratch_operands = 0 : i64, tpu.core_type = #tpu.core_type<tc>} {
    %c0 = arith.constant 0 : index
    %c0_0 = arith.constant 0 : index
    %0 = vector.load %arg0[%c0, %c0_0] : memref<16x128xf32, #tpu.memory_space<vmem>>, vector<16x128xf32>
    %cst = arith.constant 2.000000e+00 : f32
    %1 = vector.broadcast %cst : f32 to vector<16x128xf32>
    %2 = arith.mulf %0, %1 : vector<16x128xf32>
    %cst_1 = arith.constant 1.000000e+00 : f32
    %3 = vector.broadcast %cst_1 : f32 to vector<16x128xf32>
    %4 = arith.addf %2, %3 : vector<16x128xf32>
    %c0_2 = arith.constant 0 : index
    %c0_3 = arith.constant 0 : index
    %5 = vector.load %arg1[%c0_2, %c0_3] : memref<16x128xf32, #tpu.memory_space<vmem>>, vector<16x128xf32>
    tpu.vector_store %arg1[%c0_2, %c0_3], %4 {strides = array<i32>} : memref<16x128xf32, #tpu.memory_space<vmem>>, vector<16x128xf32>,
    return
  }
}

</mosaic_0001>

<bundles_post_ra>
// kernel: tpu_custom_call.1
= control target key start
LH: loop header
LB: loop body
LE: loop exit
PB: predicated region body
PF: predicated region fallthrough
CT: control target
= control target key end

     0   :  { %6 = vsyncpa [#allocation3], 0  ;;  %s128_s0 = inlined_call_operand.hbm [shape: f32[16,128], index: 0, kind: input, shape index: {}]   ;;  %s129_s1 = inlined_call_operand.hbm [shape: f32[16,128], index: 1, kind: output, shape index: {}]  }
   0x1   :  { %7 = vsyncpa [#allocation4], 0  ;;  %s12_s8 = sshll.u32 %s128_s0, 4  ;;  %s108_s9 = smov [#allocation2]   ;;  %s13_s8 = int_to_ptr.hbm [resolvable:$true] %s12_s8 }
   0x2   :  { %s14_s10 = sshll.u32 %s108_s9, 4  ;;  %s109_s11 = smov 128   ;;  %s15_s10 = int_to_ptr.vmem [resolvable:$true] %s14_s10 }
   0x3   :  { %s110_s12 = smov 8  }
   0x4   :  { %20 = dma.hbm_to_vmem [thread:$0]  %s13_s8, 256, %s15_s10, [#allocation3], %s109_s11, %s109_s11, %s110_s12  }
   0x5   :  { %104 = dma.done.wait [#allocation3], 256  }
   0x6   :  { %105 = vsyncadd [#allocation3], 4294967040  ;;  %v25_v0 = vld [vmem:[#allocation2] sm:$0xff]  ;;  %v26_v1 = vld [vmem:[#allocation2 + $0x8] sm:$0xff]  ;;  %s111_s13 = smov [#allocation5]   ;;  %s39_s17 = sshll.u32 %s129_s1, 4  ;;  %s40_s17 = int_to_ptr.hbm [resolvable:$true] %s39_s17 }
   0x7   :  { %v27_v2 = vmul.f32 2.0, %v25_v0  ;;  %v28_v3 = vmul.f32 2.0, %v26_v1  ;;  %s37_s14 = sshll.u32 %s111_s13, 4  ;;  %s38_s14 = int_to_ptr.vmem [resolvable:$true] %s37_s14 }
   0x9   :  { %v29_v4 = vadd.f32 1.0, %v27_v2  ;;  %v30_v5 = vadd.f32 1.0, %v28_v3 }
   0xb   :  { %31 = vst [vmem:[#allocation5] sm:$0xff] %v29_v4 }
   0xc   :  { %32 = vst [vmem:[#allocation5 + $0x8] sm:$0xff] %v30_v5 }
   0xd   :  { %45 = dma.vmem_to_hbm [thread:$0]  %s38_s14, 256, %s40_s17, [#allocation4], %s109_s11, %s109_s11, %s110_s12  }
   0xe   :  { %106 = dma.done.wait [#allocation4], 256  }
   0xf   :  { %107 = vsyncadd [#allocation4], 4294967040 }
  0x10   :  { %50 = vsyncpa [#allocation3], 1 }
  0x11   :  { %51 = vsyncpa [#allocation4], 1 }

</bundles_post_ra>
